<compile_context>
chip_gen: v7x
topology: tpu7x:2x2x1
jax: 0.10.0
libtpu: 0.0.40
codegen_flags: <defaults>
</compile_context>

<pallas_src>
import functools

import jax
import jax.numpy as jnp
from jax.experimental import pallas as pl
from jax.experimental.pallas import tpu as pltpu


# ----------------------------------------------------------------------------
# Shared per-channel math (mirrors torchvision.transforms.functional_tensor).
# The SAME helpers are used by the Pallas kernel, the contrast-mean pre-pass
# and the pure-JAX reference, so there is no structural divergence.
# ----------------------------------------------------------------------------
def _blend(c1, c2, ratio):
    # torchvision _blend for float images: clamp to [0, 1]
    return jnp.clip(ratio * c1 + (1.0 - ratio) * c2, 0.0, 1.0)


def _grayscale(r, g, b):
    return 0.2989 * r + 0.587 * g + 0.114 * b


def _adjust_brightness(r, g, b, factor):
    # _blend(x, 0, f) == clip(f * x, 0, 1)
    return (jnp.clip(factor * r, 0.0, 1.0),
            jnp.clip(factor * g, 0.0, 1.0),
            jnp.clip(factor * b, 0.0, 1.0))


def _adjust_contrast(r, g, b, factor, mean):
    # mean: per-image grayscale mean of the *current* state (precomputed)
    return (_blend(r, mean, factor),
            _blend(g, mean, factor),
            _blend(b, mean, factor))


def _adjust_saturation(r, g, b, factor):
    gray = _grayscale(r, g, b)
    return (_blend(r, gray, factor),
            _blend(g, gray, factor),
            _blend(b, gray, factor))


def _adjust_hue(r, g, b, hue_factor):
    # --- rgb -> hsv (torchvision _rgb2hsv) ---
    maxc = jnp.maximum(jnp.maximum(r, g), b)
    minc = jnp.minimum(jnp.minimum(r, g), b)
    eqc = maxc == minc
    cr = maxc - minc
    ones = jnp.ones_like(maxc)
    s = cr / jnp.where(eqc, ones, maxc)
    inv_cr = 1.0 / jnp.where(eqc, ones, cr)      # single reciprocal, reused 3x
    rc = (maxc - r) * inv_cr
    gc = (maxc - g) * inv_cr
    bc = (maxc - b) * inv_cr
    max_r = maxc == r
    max_g = maxc == g
    # Exactly equivalent to torchvision's hr + hg + hb mask sum.
    h = jnp.where(max_r, bc - gc,
                  jnp.where(max_g, 2.0 + rc - bc, 4.0 + gc - rc))
    h = jnp.mod(h, 6.0) / 6.0        # == fmod(h/6 + 1, 1) for h in (-6, 6)

    # --- hue shift ---
    h = jnp.mod(h + hue_factor, 1.0)

    # --- hsv -> rgb (torchvision _hsv2rgb), float-domain sextant index ---
    v = maxc
    h6 = h * 6.0
    i6 = jnp.floor(h6)
    f = h6 - i6
    i6 = jnp.where(i6 >= 6.0, 0.0, i6)           # matches torch's i % 6 (h == 1.0)
    p = jnp.clip(v * (1.0 - s), 0.0, 1.0)
    q = jnp.clip(v * (1.0 - s * f), 0.0, 1.0)
    t = jnp.clip(v * (1.0 - s * (1.0 - f)), 0.0, 1.0)

    def pick(c0, c1, c2, c3, c4, c5):
        return jnp.where(i6 < 0.5, c0,
               jnp.where(i6 < 1.5, c1,
               jnp.where(i6 < 2.5, c2,
               jnp.where(i6 < 3.5, c3,
               jnp.where(i6 < 4.5, c4, c5)))))

    return pick(v, q, p, p, t, v), pick(t, v, v, q, p, p), pick(p, p, t, v, v, q)


def _apply_one(fn_id, r, g, b, bf, cf, sf, hf, mean):
    if fn_id == 0:
        return _adjust_brightness(r, g, b, bf)
    if fn_id == 1:
        return _adjust_contrast(r, g, b, cf, mean)
    if fn_id == 2:
        return _adjust_saturation(r, g, b, sf)
    return _adjust_hue(r, g, b, hf)


# ----------------------------------------------------------------------------
# Contrast-mean pre-pass (plain JAX): grayscale mean of the state right before
# the contrast step. Hoisting this out of the kernel keeps the kernel purely
# elementwise (tileable over pixels) and removes the reduce-order divergence.
# ----------------------------------------------------------------------------
def _precontrast_gray_mean(img, factors, fn_order):
    r, g, b = img[:, 0], img[:, 1], img[:, 2]          # (B, H, W) each
    bf, cf, sf, hf = factors[0], factors[1], factors[2], factors[3]
    for fn_id in fn_order:
        fn_id = int(fn_id)
        if fn_id == 1:
            break
        r, g, b = _apply_one(fn_id, r, g, b, bf, cf, sf, hf, 0.0)
    return jnp.mean(_grayscale(r, g, b), axis=(-2, -1))   # (B,)


# ----------------------------------------------------------------------------
# Pallas kernel: purely elementwise pipeline on a (1, 3, TR, 128) pixel tile.
# ----------------------------------------------------------------------------
def _color_jitter_kernel(fn_order, fac_ref, mean_ref, img_ref, out_ref):
    # fac_ref : (4,) f32 SMEM  -> [brightness, contrast, saturation, hue]
    # mean_ref: (B,) f32 SMEM  -> per-image pre-contrast grayscale mean
    # img_ref / out_ref: (1, 3, TR, 128) VMEM tiles
    bf = fac_ref[0]
    cf = fac_ref[1]
    sf = fac_ref[2]
    hf = fac_ref[3]
    m = mean_ref[pl.program_id(0)]                 # scalar for this image

    r = img_ref[0, 0].astype(jnp.float32)
    g = img_ref[0, 1].astype(jnp.float32)
    b = img_ref[0, 2].astype(jnp.float32)

    for fn_id in fn_order:                         # static unroll (baked order)
        r, g, b = _apply_one(int(fn_id), r, g, b, bf, cf, sf, hf, m)

    out_ref[0, 0] = r.astype(out_ref.dtype)
    out_ref[0, 1] = g.astype(out_ref.dtype)
    out_ref[0, 2] = b.astype(out_ref.dtype)


def ext_color_jitter_pallas(img, tgt, factors, fn_order, *, max_rows_per_tile=512):
    """Color-jitter `img` (B, 3, H, W); returns (jittered_img, tgt) like
    ExtColorJitter.forward (tgt is passed through untouched)."""
    B, C, H, W = img.shape
    assert C == 3, "ExtColorJitter kernel expects 3-channel RGB images"
    fn_order = tuple(int(x) for x in fn_order)
    factors = jnp.asarray(factors, dtype=jnp.float32)

    # Per-image contrast mean (cheap JAX pre-pass), fed to the kernel via SMEM.
    means = _precontrast_gray_mean(img.astype(jnp.float32), factors, fn_order)
    means = means.astype(jnp.float32)

    # Lane-dense layout: pixels -> (rows, 128). Tile over rows.
    P = H * W
    R = -(-P // 128)                        # ceil(P / 128)
    if R <= max_rows_per_tile:
        TR, R_pad = R, R
    else:
        TR = max_rows_per_tile
        R_pad = -(-R // TR) * TR
    P_pad = R_pad * 128

    img_flat = img.reshape(B, C, P)
    if P_pad != P:                          # pad is elementwise-safe (sliced off)
        img_flat = jnp.pad(img_flat, ((0, 0), (0, 0), (0, P_pad - P)))
    img_tiled = img_flat.reshape(B, C, R_pad, 128)
    GP = R_pad // TR

    kernel = functools.partial(_color_jitter_kernel, fn_order)
    grid_spec = pltpu.PrefetchScalarGridSpec(
        num_scalar_prefetch=0,
        grid=(B, GP),
        in_specs=[
            pl.BlockSpec(memory_space=pltpu.MemorySpace.SMEM),    # factors (4,)
            pl.BlockSpec(memory_space=pltpu.MemorySpace.SMEM),    # means (B,)
            pl.BlockSpec((1, C, TR, 128), lambda b, p: (b, 0, p, 0)),
        ],
        out_specs=pl.BlockSpec((1, C, TR, 128), lambda b, p: (b, 0, p, 0)),
    )

    out_tiled = pl.pallas_call(
        kernel,
        out_shape=jax.ShapeDtypeStruct((B, C, R_pad, 128), img.dtype),
        grid_spec=grid_spec,
        compiler_params=pltpu.CompilerParams(
            dimension_semantics=("parallel", "parallel"),
            vmem_limit_bytes=32 * 1024 * 1024,
        ),
    )(factors, means, img_tiled)

    out = out_tiled.reshape(B, C, P_pad)[:, :, :P].reshape(B, C, H, W)
    return out, tgt


# ----------------------------------------------------------------------------
# Pure-JAX reference (same helpers, same precomputed contrast mean).
# ----------------------------------------------------------------------------
def ext_color_jitter_ref(img, factors, fn_order):
    factors = jnp.asarray(factors, dtype=jnp.float32)
    fn_order = tuple(int(x) for x in fn_order)
    means = _precontrast_gray_mean(img.astype(jnp.float32), factors, fn_order)
    m = means[:, None, None]
    r, g, b = img[:, 0], img[:, 1], img[:, 2]
    bf, cf, sf, hf = factors[0], factors[1], factors[2], factors[3]
    for fn_id in fn_order:
        r, g, b = _apply_one(int(fn_id), r, g, b, bf, cf, sf, hf, m)
    return jnp.stack([r, g, b], axis=1).astype(img.dtype)


# ----------------------------------------------------------------------------
# Deterministic "get_params" (mirrors ExtColorJitter.get_params with a fixed
# JAX PRNG key instead of torch RNG state).
# ----------------------------------------------------------------------------
def get_params_deterministic(key, brightness, contrast, saturation, hue):
    k_perm, kb, kc, ks, kh = jax.random.split(key, 5)
    fn_idx = [int(x) for x in jax.random.permutation(k_perm, 4)]

    b_lo, b_hi = max(0.0, 1.0 - brightness), 1.0 + brightness
    c_lo, c_hi = max(0.0, 1.0 - contrast), 1.0 + contrast
    s_lo, s_hi = max(0.0, 1.0 - saturation), 1.0 + saturation
    h_lo, h_hi = -hue, hue

    bf = float(jax.random.uniform(kb, (), minval=b_lo, maxval=b_hi))
    cf = float(jax.random.uniform(kc, (), minval=c_lo, maxval=c_hi))
    sf = float(jax.random.uniform(ks, (), minval=s_lo, maxval=s_hi))
    hf = float(jax.random.uniform(kh, (), minval=h_lo, maxval=h_hi))
    return fn_idx, (bf, cf, sf, hf)


if __name__ == "__main__":
    key = jax.random.PRNGKey(0)
    k_img, k_tgt, k_params = jax.random.split(key, 3)

    B, C, H, W = 2, 3, 16, 16
    img = jax.random.uniform(k_img, (B, C, H, W), dtype=jnp.float32)    # RGB in [0,1]
    tgt = jax.random.randint(k_tgt, (B, H, W), 0, 10, dtype=jnp.int32)  # seg-style target

    # ExtColorJitter(brightness=0.4, contrast=0.4, saturation=0.4, hue=0.1)
    fn_order, factors = get_params_deterministic(k_params, 0.4, 0.4, 0.4, 0.1)
    factors_arr = jnp.asarray(factors, dtype=jnp.float32)

    out_img, out_tgt = ext_color_jitter_pallas(img, tgt, factors_arr, fn_order)
    out_img = jax.block_until_ready(out_img)
    out_tgt = jax.block_until_ready(out_tgt)

    ref_img = ext_color_jitter_ref(img, factors_arr, fn_order)

    assert out_img.shape == img.shape and out_img.dtype == img.dtype
    assert out_tgt.shape == tgt.shape and out_tgt.dtype == tgt.dtype
    assert bool(jnp.all(out_tgt == tgt))

    # Tolerance covers Mosaic-vs-XLA elementwise rounding (FMA / divide) near
    # the hue branch boundaries; 1e-4 is well below one uint8 quantization step.
    err = float(jnp.max(jnp.abs(out_img - ref_img)))
    assert err <= 1e-4, f"max abs err {err}"

    print("KERNEL_OK")
</pallas_src>

<mosaic_0001>
module attributes {stable_mosaic.version = 11 : i64} {
  func.func @_color_jitter_kernel(%arg0: i32, %arg1: i32, %arg2: memref<4xf32, #tpu.memory_space<smem>>, %arg3: memref<2xf32, #tpu.memory_space<smem>>, %arg4: memref<1x3x2x128xf32, #tpu.memory_space<vmem>>, %arg5: memref<1x3x2x128xf32, #tpu.memory_space<vmem>>) attributes {dimension_semantics = [#tpu.dimension_semantics<parallel>, #tpu.dimension_semantics<parallel>], iteration_bounds = array<i64: 2, 1>, scalar_prefetch = 0 : i64, scratch_operands = 0 : i64, tpu.core_type = #tpu.core_type<tc>, window_params = [{transform_indices = @transform_0, window_bounds = array<i64: 4>}, {transform_indices = @transform_1, window_bounds = array<i64: 2>}, {transform_indices = @transform_2, window_bounds = array<i64: 1, 3, 2, 128>}, {transform_indices = @transform_3, window_bounds = array<i64: 1, 3, 2, 128>}]} {
    %c0 = arith.constant 0 : index
    %0 = memref.load %arg2[%c0] : memref<4xf32, #tpu.memory_space<smem>>
    %c1 = arith.constant 1 : index
    %1 = memref.load %arg2[%c1] : memref<4xf32, #tpu.memory_space<smem>>
    %c2 = arith.constant 2 : index
    %2 = memref.load %arg2[%c2] : memref<4xf32, #tpu.memory_space<smem>>
    %c3 = arith.constant 3 : index
    %3 = memref.load %arg2[%c3] : memref<4xf32, #tpu.memory_space<smem>>
    %4 = arith.index_cast %arg0 : i32 to index
    %5 = memref.load %arg3[%4] : memref<2xf32, #tpu.memory_space<smem>>
    %c0_0 = arith.constant 0 : index
    %c0_1 = arith.constant 0 : index
    %c0_2 = arith.constant 0 : index
    %c0_3 = arith.constant 0 : index
    %6 = vector.load %arg4[%c0_0, %c0_1, %c0_2, %c0_3] : memref<1x3x2x128xf32, #tpu.memory_space<vmem>>, vector<1x1x2x128xf32>
    %7 = vector.shape_cast %6 : vector<1x1x2x128xf32> to vector<2x128xf32>
    %c0_4 = arith.constant 0 : index
    %c1_5 = arith.constant 1 : index
    %c0_6 = arith.constant 0 : index
    %c0_7 = arith.constant 0 : index
    %8 = vector.load %arg4[%c0_4, %c1_5, %c0_6, %c0_7] : memref<1x3x2x128xf32, #tpu.memory_space<vmem>>, vector<1x1x2x128xf32>
    %9 = vector.shape_cast %8 : vector<1x1x2x128xf32> to vector<2x128xf32>
    %c0_8 = arith.constant 0 : index
    %c2_9 = arith.constant 2 : index
    %c0_10 = arith.constant 0 : index
    %c0_11 = arith.constant 0 : index
    %10 = vector.load %arg4[%c0_8, %c2_9, %c0_10, %c0_11] : memref<1x3x2x128xf32, #tpu.memory_space<vmem>>, vector<1x1x2x128xf32>
    %11 = vector.shape_cast %10 : vector<1x1x2x128xf32> to vector<2x128xf32>
    %12 = vector.broadcast %1 : f32 to vector<2x128xf32>
    %13 = arith.mulf %12, %7 : vector<2x128xf32>
    %cst = arith.constant 1.000000e+00 : f32
    %14 = arith.subf %cst, %1 : f32
    %15 = arith.mulf %14, %5 : f32
    %16 = vector.broadcast %15 : f32 to vector<2x128xf32>
    %17 = arith.addf %13, %16 : vector<2x128xf32>
    %cst_12 = arith.constant 0.000000e+00 : f32
    %cst_13 = arith.constant 1.000000e+00 : f32
    %18 = vector.broadcast %cst_12 : f32 to vector<2x128xf32>
    %19 = arith.maximumf %18, %17 : vector<2x128xf32>
    %20 = vector.broadcast %cst_13 : f32 to vector<2x128xf32>
    %21 = arith.minimumf %20, %19 : vector<2x128xf32>
    %22 = vector.broadcast %1 : f32 to vector<2x128xf32>
    %23 = arith.mulf %22, %9 : vector<2x128xf32>
    %cst_14 = arith.constant 1.000000e+00 : f32
    %24 = arith.subf %cst_14, %1 : f32
    %25 = arith.mulf %24, %5 : f32
    %26 = vector.broadcast %25 : f32 to vector<2x128xf32>
    %27 = arith.addf %23, %26 : vector<2x128xf32>
    %cst_15 = arith.constant 0.000000e+00 : f32
    %cst_16 = arith.constant 1.000000e+00 : f32
    %28 = vector.broadcast %cst_15 : f32 to vector<2x128xf32>
    %29 = arith.maximumf %28, %27 : vector<2x128xf32>
    %30 = vector.broadcast %cst_16 : f32 to vector<2x128xf32>
    %31 = arith.minimumf %30, %29 : vector<2x128xf32>
    %32 = vector.broadcast %1 : f32 to vector<2x128xf32>
    %33 = arith.mulf %32, %11 : vector<2x128xf32>
    %cst_17 = arith.constant 1.000000e+00 : f32
    %34 = arith.subf %cst_17, %1 : f32
    %35 = arith.mulf %34, %5 : f32
    %36 = vector.broadcast %35 : f32 to vector<2x128xf32>
    %37 = arith.addf %33, %36 : vector<2x128xf32>
    %cst_18 = arith.constant 0.000000e+00 : f32
    %cst_19 = arith.constant 1.000000e+00 : f32
    %38 = vector.broadcast %cst_18 : f32 to vector<2x128xf32>
    %39 = arith.maximumf %38, %37 : vector<2x128xf32>
    %40 = vector.broadcast %cst_19 : f32 to vector<2x128xf32>
    %41 = arith.minimumf %40, %39 : vector<2x128xf32>
    %cst_20 = arith.constant 2.989000e-01 : f32
    %42 = vector.broadcast %cst_20 : f32 to vector<2x128xf32>
    %43 = arith.mulf %42, %21 : vector<2x128xf32>
    %cst_21 = arith.constant 5.870000e-01 : f32
    %44 = vector.broadcast %cst_21 : f32 to vector<2x128xf32>
    %45 = arith.mulf %44, %31 : vector<2x128xf32>
    %46 = arith.addf %43, %45 : vector<2x128xf32>
    %cst_22 = arith.constant 1.140000e-01 : f32
    %47 = vector.broadcast %cst_22 : f32 to vector<2x128xf32>
    %48 = arith.mulf %47, %41 : vector<2x128xf32>
    %49 = arith.addf %46, %48 : vector<2x128xf32>
    %50 = vector.broadcast %2 : f32 to vector<2x128xf32>
    %51 = arith.mulf %50, %21 : vector<2x128xf32>
    %cst_23 = arith.constant 1.000000e+00 : f32
    %52 = arith.subf %cst_23, %2 : f32
    %53 = vector.broadcast %52 : f32 to vector<2x128xf32>
    %54 = arith.mulf %53, %49 : vector<2x128xf32>
    %55 = arith.addf %51, %54 : vector<2x128xf32>
    %cst_24 = arith.constant 0.000000e+00 : f32
    %cst_25 = arith.constant 1.000000e+00 : f32
    %56 = vector.broadcast %cst_24 : f32 to vector<2x128xf32>
    %57 = arith.maximumf %56, %55 : vector<2x128xf32>
    %58 = vector.broadcast %cst_25 : f32 to vector<2x128xf32>
    %59 = arith.minimumf %58, %57 : vector<2x128xf32>
    %60 = vector.broadcast %2 : f32 to vector<2x128xf32>
    %61 = arith.mulf %60, %31 : vector<2x128xf32>
    %cst_26 = arith.constant 1.000000e+00 : f32
    %62 = arith.subf %cst_26, %2 : f32
    %63 = vector.broadcast %62 : f32 to vector<2x128xf32>
    %64 = arith.mulf %63, %49 : vector<2x128xf32>
    %65 = arith.addf %61, %64 : vector<2x128xf32>
    %cst_27 = arith.constant 0.000000e+00 : f32
    %cst_28 = arith.constant 1.000000e+00 : f32
    %66 = vector.broadcast %cst_27 : f32 to vector<2x128xf32>
    %67 = arith.maximumf %66, %65 : vector<2x128xf32>
    %68 = vector.broadcast %cst_28 : f32 to vector<2x128xf32>
    %69 = arith.minimumf %68, %67 : vector<2x128xf32>
    %70 = vector.broadcast %2 : f32 to vector<2x128xf32>
    %71 = arith.mulf %70, %41 : vector<2x128xf32>
    %cst_29 = arith.constant 1.000000e+00 : f32
    %72 = arith.subf %cst_29, %2 : f32
    %73 = vector.broadcast %72 : f32 to vector<2x128xf32>
    %74 = arith.mulf %73, %49 : vector<2x128xf32>
    %75 = arith.addf %71, %74 : vector<2x128xf32>
    %cst_30 = arith.constant 0.000000e+00 : f32
    %cst_31 = arith.constant 1.000000e+00 : f32
    %76 = vector.broadcast %cst_30 : f32 to vector<2x128xf32>
    %77 = arith.maximumf %76, %75 : vector<2x128xf32>
    %78 = vector.broadcast %cst_31 : f32 to vector<2x128xf32>
    %79 = arith.minimumf %78, %77 : vector<2x128xf32>
    %80 = arith.maximumf %59, %69 : vector<2x128xf32>
    %81 = arith.maximumf %80, %79 : vector<2x128xf32>
    %82 = arith.minimumf %59, %69 : vector<2x128xf32>
    %83 = arith.minimumf %82, %79 : vector<2x128xf32>
    %84 = arith.cmpf oeq, %81, %83 : vector<2x128xf32>
    %85 = arith.subf %81, %83 : vector<2x128xf32>
    %cst_32 = arith.constant 1.000000e+00 : f32
    %86 = vector.broadcast %cst_32 : f32 to vector<2x128xf32>
    %87 = arith.select %84, %86, %81 : vector<2x128xi1>, vector<2x128xf32>
    %88 = arith.divf %85, %87 : vector<2x128xf32>
    %89 = arith.select %84, %86, %85 : vector<2x128xi1>, vector<2x128xf32>
    %cst_33 = arith.constant 1.000000e+00 : f32
    %90 = vector.broadcast %cst_33 : f32 to vector<2x128xf32>
    %91 = arith.divf %90, %89 : vector<2x128xf32>
    %92 = arith.subf %81, %59 : vector<2x128xf32>
    %93 = arith.mulf %92, %91 : vector<2x128xf32>
    %94 = arith.subf %81, %69 : vector<2x128xf32>
    %95 = arith.mulf %94, %91 : vector<2x128xf32>
    %96 = arith.subf %81, %79 : vector<2x128xf32>
    %97 = arith.mulf %96, %91 : vector<2x128xf32>
    %98 = arith.cmpf oeq, %81, %59 : vector<2x128xf32>
    %99 = arith.cmpf oeq, %81, %69 : vector<2x128xf32>
    %100 = arith.subf %97, %95 : vector<2x128xf32>
    %cst_34 = arith.constant 2.000000e+00 : f32
    %101 = vector.broadcast %cst_34 : f32 to vector<2x128xf32>
    %102 = arith.addf %101, %93 : vector<2x128xf32>
    %103 = arith.subf %102, %97 : vector<2x128xf32>
    %cst_35 = arith.constant 4.000000e+00 : f32
    %104 = vector.broadcast %cst_35 : f32 to vector<2x128xf32>
    %105 = arith.addf %104, %95 : vector<2x128xf32>
    %106 = arith.subf %105, %93 : vector<2x128xf32>
    %107 = arith.select %99, %103, %106 : vector<2x128xi1>, vector<2x128xf32>
    %108 = arith.select %98, %100, %107 : vector<2x128xi1>, vector<2x128xf32>
    %cst_36 = arith.constant 6.000000e+00 : f32
    %109 = vector.broadcast %cst_36 : f32 to vector<2x128xf32>
    %110 = arith.remf %108, %109 : vector<2x128xf32>
    %cst_37 = arith.constant 0.000000e+00 : f32
    %111 = vector.broadcast %cst_37 : f32 to vector<2x128xf32>
    %112 = arith.cmpf one, %110, %111 : vector<2x128xf32>
    %cst_38 = arith.constant 0.000000e+00 : f32
    %113 = vector.broadcast %cst_38 : f32 to vector<2x128xf32>
    %114 = arith.cmpf olt, %110, %113 : vector<2x128xf32>
    %cst_39 = arith.constant 0.000000e+00 : f32
    %115 = arith.cmpf olt, %cst_36, %cst_39 : f32
    %116 = vector.broadcast %115 : i1 to vector<2x128xi1>
    %117 = vector.broadcast %116 : vector<2x128xi1> to vector<2x128xi1>
    %118 = arith.xori %114, %117 : vector<2x128xi1>
    %119 = arith.andi %118, %112 : vector<2x128xi1>
    %120 = vector.broadcast %cst_36 : f32 to vector<2x128xf32>
    %121 = arith.addf %110, %120 : vector<2x128xf32>
    %122 = arith.select %119, %121, %110 : vector<2x128xi1>, vector<2x128xf32>
    %cst_40 = arith.constant 6.000000e+00 : f32
    %123 = vector.broadcast %cst_40 : f32 to vector<2x128xf32>
    %124 = arith.divf %122, %123 : vector<2x128xf32>
    %125 = vector.broadcast %3 : f32 to vector<2x128xf32>
    %126 = arith.addf %124, %125 : vector<2x128xf32>
    %cst_41 = arith.constant 1.000000e+00 : f32
    %127 = vector.broadcast %cst_41 : f32 to vector<2x128xf32>
    %128 = arith.remf %126, %127 : vector<2x128xf32>
    %cst_42 = arith.constant 0.000000e+00 : f32
    %129 = vector.broadcast %cst_42 : f32 to vector<2x128xf32>
    %130 = arith.cmpf one, %128, %129 : vector<2x128xf32>
    %cst_43 = arith.constant 0.000000e+00 : f32
    %131 = vector.broadcast %cst_43 : f32 to vector<2x128xf32>
    %132 = arith.cmpf olt, %128, %131 : vector<2x128xf32>
    %cst_44 = arith.constant 0.000000e+00 : f32
    %133 = arith.cmpf olt, %cst_41, %cst_44 : f32
    %134 = vector.broadcast %133 : i1 to vector<2x128xi1>
    %135 = vector.broadcast %134 : vector<2x128xi1> to vector<2x128xi1>
    %136 = arith.xori %132, %135 : vector<2x128xi1>
    %137 = arith.andi %136, %130 : vector<2x128xi1>
    %138 = vector.broadcast %cst_41 : f32 to vector<2x128xf32>
    %139 = arith.addf %128, %138 : vector<2x128xf32>
    %140 = arith.select %137, %139, %128 : vector<2x128xi1>, vector<2x128xf32>
    %cst_45 = arith.constant 6.000000e+00 : f32
    %141 = vector.broadcast %cst_45 : f32 to vector<2x128xf32>
    %142 = arith.mulf %140, %141 : vector<2x128xf32>
    %143 = math.floor %142 : vector<2x128xf32>
    %144 = arith.subf %142, %143 : vector<2x128xf32>
    %cst_46 = arith.constant 6.000000e+00 : f32
    %145 = vector.broadcast %cst_46 : f32 to vector<2x128xf32>
    %146 = arith.cmpf oge, %143, %145 : vector<2x128xf32>
    %cst_47 = arith.constant 0.000000e+00 : f32
    %147 = vector.broadcast %cst_47 : f32 to vector<2x128xf32>
    %148 = arith.select %146, %147, %143 : vector<2x128xi1>, vector<2x128xf32>
    %cst_48 = arith.constant 1.000000e+00 : f32
    %149 = vector.broadcast %cst_48 : f32 to vector<2x128xf32>
    %150 = arith.subf %149, %88 : vector<2x128xf32>
    %151 = arith.mulf %81, %150 : vector<2x128xf32>
    %cst_49 = arith.constant 0.000000e+00 : f32
    %cst_50 = arith.constant 1.000000e+00 : f32
    %152 = vector.broadcast %cst_49 : f32 to vector<2x128xf32>
    %153 = arith.maximumf %152, %151 : vector<2x128xf32>
    %154 = vector.broadcast %cst_50 : f32 to vector<2x128xf32>
    %155 = arith.minimumf %154, %153 : vector<2x128xf32>
    %156 = arith.mulf %88, %144 : vector<2x128xf32>
    %cst_51 = arith.constant 1.000000e+00 : f32
    %157 = vector.broadcast %cst_51 : f32 to vector<2x128xf32>
    %158 = arith.subf %157, %156 : vector<2x128xf32>
    %159 = arith.mulf %81, %158 : vector<2x128xf32>
    %cst_52 = arith.constant 0.000000e+00 : f32
    %cst_53 = arith.constant 1.000000e+00 : f32
    %160 = vector.broadcast %cst_52 : f32 to vector<2x128xf32>
    %161 = arith.maximumf %160, %159 : vector<2x128xf32>
    %162 = vector.broadcast %cst_53 : f32 to vector<2x128xf32>
    %163 = arith.minimumf %162, %161 : vector<2x128xf32>
    %cst_54 = arith.constant 1.000000e+00 : f32
    %164 = vector.broadcast %cst_54 : f32 to vector<2x128xf32>
    %165 = arith.subf %164, %144 : vector<2x128xf32>
    %166 = arith.mulf %88, %165 : vector<2x128xf32>
    %cst_55 = arith.constant 1.000000e+00 : f32
    %167 = vector.broadcast %cst_55 : f32 to vector<2x128xf32>
    %168 = arith.subf %167, %166 : vector<2x128xf32>
    %169 = arith.mulf %81, %168 : vector<2x128xf32>
    %cst_56 = arith.constant 0.000000e+00 : f32
    %cst_57 = arith.constant 1.000000e+00 : f32
    %170 = vector.broadcast %cst_56 : f32 to vector<2x128xf32>
    %171 = arith.maximumf %170, %169 : vector<2x128xf32>
    %172 = vector.broadcast %cst_57 : f32 to vector<2x128xf32>
    %173 = arith.minimumf %172, %171 : vector<2x128xf32>
    %cst_58 = arith.constant 5.000000e-01 : f32
    %174 = vector.broadcast %cst_58 : f32 to vector<2x128xf32>
    %175 = arith.cmpf olt, %148, %174 : vector<2x128xf32>
    %cst_59 = arith.constant 1.500000e+00 : f32
    %176 = vector.broadcast %cst_59 : f32 to vector<2x128xf32>
    %177 = arith.cmpf olt, %148, %176 : vector<2x128xf32>
    %cst_60 = arith.constant 2.500000e+00 : f32
    %178 = vector.broadcast %cst_60 : f32 to vector<2x128xf32>
    %179 = arith.cmpf olt, %148, %178 : vector<2x128xf32>
    %cst_61 = arith.constant 3.500000e+00 : f32
    %180 = vector.broadcast %cst_61 : f32 to vector<2x128xf32>
    %181 = arith.cmpf olt, %148, %180 : vector<2x128xf32>
    %cst_62 = arith.constant 4.500000e+00 : f32
    %182 = vector.broadcast %cst_62 : f32 to vector<2x128xf32>
    %183 = arith.cmpf olt, %148, %182 : vector<2x128xf32>
    %184 = arith.select %183, %173, %81 : vector<2x128xi1>, vector<2x128xf32>
    %185 = arith.select %181, %155, %184 : vector<2x128xi1>, vector<2x128xf32>
    %186 = arith.select %179, %155, %185 : vector<2x128xi1>, vector<2x128xf32>
    %187 = arith.select %177, %163, %186 : vector<2x128xi1>, vector<2x128xf32>
    %188 = arith.select %175, %81, %187 : vector<2x128xi1>, vector<2x128xf32>
    %cst_63 = arith.constant 5.000000e-01 : f32
    %189 = vector.broadcast %cst_63 : f32 to vector<2x128xf32>
    %190 = arith.cmpf olt, %148, %189 : vector<2x128xf32>
    %cst_64 = arith.constant 1.500000e+00 : f32
    %191 = vector.broadcast %cst_64 : f32 to vector<2x128xf32>
    %192 = arith.cmpf olt, %148, %191 : vector<2x128xf32>
    %cst_65 = arith.constant 2.500000e+00 : f32
    %193 = vector.broadcast %cst_65 : f32 to vector<2x128xf32>
    %194 = arith.cmpf olt, %148, %193 : vector<2x128xf32>
    %cst_66 = arith.constant 3.500000e+00 : f32
    %195 = vector.broadcast %cst_66 : f32 to vector<2x128xf32>
    %196 = arith.cmpf olt, %148, %195 : vector<2x128xf32>
    %cst_67 = arith.constant 4.500000e+00 : f32
    %197 = vector.broadcast %cst_67 : f32 to vector<2x128xf32>
    %198 = arith.cmpf olt, %148, %197 : vector<2x128xf32>
    %199 = arith.select %198, %155, %155 : vector<2x128xi1>, vector<2x128xf32>
    %200 = arith.select %196, %163, %199 : vector<2x128xi1>, vector<2x128xf32>
    %201 = arith.select %194, %81, %200 : vector<2x128xi1>, vector<2x128xf32>
    %202 = arith.select %192, %81, %201 : vector<2x128xi1>, vector<2x128xf32>
    %203 = arith.select %190, %173, %202 : vector<2x128xi1>, vector<2x128xf32>
    %cst_68 = arith.constant 5.000000e-01 : f32
    %204 = vector.broadcast %cst_68 : f32 to vector<2x128xf32>
    %205 = arith.cmpf olt, %148, %204 : vector<2x128xf32>
    %cst_69 = arith.constant 1.500000e+00 : f32
    %206 = vector.broadcast %cst_69 : f32 to vector<2x128xf32>
    %207 = arith.cmpf olt, %148, %206 : vector<2x128xf32>
    %cst_70 = arith.constant 2.500000e+00 : f32
    %208 = vector.broadcast %cst_70 : f32 to vector<2x128xf32>
    %209 = arith.cmpf olt, %148, %208 : vector<2x128xf32>
    %cst_71 = arith.constant 3.500000e+00 : f32
    %210 = vector.broadcast %cst_71 : f32 to vector<2x128xf32>
    %211 = arith.cmpf olt, %148, %210 : vector<2x128xf32>
    %cst_72 = arith.constant 4.500000e+00 : f32
    %212 = vector.broadcast %cst_72 : f32 to vector<2x128xf32>
    %213 = arith.cmpf olt, %148, %212 : vector<2x128xf32>
    %214 = arith.select %213, %81, %163 : vector<2x128xi1>, vector<2x128xf32>
    %215 = arith.select %211, %81, %214 : vector<2x128xi1>, vector<2x128xf32>
    %216 = arith.select %209, %173, %215 : vector<2x128xi1>, vector<2x128xf32>
    %217 = arith.select %207, %155, %216 : vector<2x128xi1>, vector<2x128xf32>
    %218 = arith.select %205, %155, %217 : vector<2x128xi1>, vector<2x128xf32>
    %219 = vector.broadcast %0 : f32 to vector<2x128xf32>
    %220 = arith.mulf %219, %188 : vector<2x128xf32>
    %cst_73 = arith.constant 0.000000e+00 : f32
    %cst_74 = arith.constant 1.000000e+00 : f32
    %221 = vector.broadcast %cst_73 : f32 to vector<2x128xf32>
    %222 = arith.maximumf %221, %220 : vector<2x128xf32>
    %223 = vector.broadcast %cst_74 : f32 to vector<2x128xf32>
    %224 = arith.minimumf %223, %222 : vector<2x128xf32>
    %225 = vector.broadcast %0 : f32 to vector<2x128xf32>
    %226 = arith.mulf %225, %203 : vector<2x128xf32>
    %cst_75 = arith.constant 0.000000e+00 : f32
    %cst_76 = arith.constant 1.000000e+00 : f32
    %227 = vector.broadcast %cst_75 : f32 to vector<2x128xf32>
    %228 = arith.maximumf %227, %226 : vector<2x128xf32>
    %229 = vector.broadcast %cst_76 : f32 to vector<2x128xf32>
    %230 = arith.minimumf %229, %228 : vector<2x128xf32>
    %231 = vector.broadcast %0 : f32 to vector<2x128xf32>
    %232 = arith.mulf %231, %218 : vector<2x128xf32>
    %cst_77 = arith.constant 0.000000e+00 : f32
    %cst_78 = arith.constant 1.000000e+00 : f32
    %233 = vector.broadcast %cst_77 : f32 to vector<2x128xf32>
    %234 = arith.maximumf %233, %232 : vector<2x128xf32>
    %235 = vector.broadcast %cst_78 : f32 to vector<2x128xf32>
    %236 = arith.minimumf %235, %234 : vector<2x128xf32>
    %c0_79 = arith.constant 0 : index
    %c0_80 = arith.constant 0 : index
    %c0_81 = arith.constant 0 : index
    %c0_82 = arith.constant 0 : index
    %237 = vector.load %arg5[%c0_79, %c0_80, %c0_81, %c0_82] : memref<1x3x2x128xf32, #tpu.memory_space<vmem>>, vector<1x1x2x128xf32>
    %238 = vector.shape_cast %237 : vector<1x1x2x128xf32> to vector<2x128xf32>
    %239 = vector.shape_cast %224 : vector<2x128xf32> to vector<1x1x2x128xf32>
    tpu.vector_store %arg5[%c0_79, %c0_80, %c0_81, %c0_82], %239 {strides = array<i32>} : memref<1x3x2x128xf32, #tpu.memory_space<vmem>>, vector<1x1x2x128xf32>,
    %c0_83 = arith.constant 0 : index
    %c1_84 = arith.constant 1 : index
    %c0_85 = arith.constant 0 : index
    %c0_86 = arith.constant 0 : index
    %240 = vector.load %arg5[%c0_83, %c1_84, %c0_85, %c0_86] : memref<1x3x2x128xf32, #tpu.memory_space<vmem>>, vector<1x1x2x128xf32>
    %241 = vector.shape_cast %240 : vector<1x1x2x128xf32> to vector<2x128xf32>
    %242 = vector.shape_cast %230 : vector<2x128xf32> to vector<1x1x2x128xf32>
    tpu.vector_store %arg5[%c0_83, %c1_84, %c0_85, %c0_86], %242 {strides = array<i32>} : memref<1x3x2x128xf32, #tpu.memory_space<vmem>>, vector<1x1x2x128xf32>,
    %c0_87 = arith.constant 0 : index
    %c2_88 = arith.constant 2 : index
    %c0_89 = arith.constant 0 : index
    %c0_90 = arith.constant 0 : index
    %243 = vector.load %arg5[%c0_87, %c2_88, %c0_89, %c0_90] : memref<1x3x2x128xf32, #tpu.memory_space<vmem>>, vector<1x1x2x128xf32>
    %244 = vector.shape_cast %243 : vector<1x1x2x128xf32> to vector<2x128xf32>
    %245 = vector.shape_cast %236 : vector<2x128xf32> to vector<1x1x2x128xf32>
    tpu.vector_store %arg5[%c0_87, %c2_88, %c0_89, %c0_90], %245 {strides = array<i32>} : memref<1x3x2x128xf32, #tpu.memory_space<vmem>>, vector<1x1x2x128xf32>,
    return
  }
  func.func @transform_0(%arg0: i32, %arg1: i32) -> i32 {
    %c0_i32 = arith.constant 0 : i32
    %c0_i32_0 = arith.constant 0 : i32
    return %c0_i32 : i32
  }
  func.func @transform_1(%arg0: i32, %arg1: i32) -> i32 {
    %c0_i32 = arith.constant 0 : i32
    %c0_i32_0 = arith.constant 0 : i32
    return %c0_i32 : i32
  }
  func.func @transform_2(%arg0: i32, %arg1: i32) -> (i32, i32, i32, i32) {
    %c0_i32 = arith.constant 0 : i32
    %c0_i32_0 = arith.constant 0 : i32
    %c0_i32_1 = arith.constant 0 : i32
    return %arg0, %c0_i32, %arg1, %c0_i32_0 : i32, i32, i32, i32
  }
  func.func @transform_3(%arg0: i32, %arg1: i32) -> (i32, i32, i32, i32) {
    %c0_i32 = arith.constant 0 : i32
    %c0_i32_0 = arith.constant 0 : i32
    %c0_i32_1 = arith.constant 0 : i32
    return %arg0, %c0_i32, %arg1, %c0_i32_0 : i32, i32, i32, i32
  }
}

</mosaic_0001>

<bundles_post_ra>
// kernel: tpu_custom_call.1
= control target key start
LH: loop header
LB: loop body
LE: loop exit
PB: predicated region body
PF: predicated region fallthrough
CT: control target
= control target key end

     0   :  { %8 = vsyncpa [#allocation5], 0  ;;  %s1070_s0 = inlined_call_operand.hbm [shape: f32[4], index: 0, kind: input, shape index: {}]   ;;  %s1071_s1 = inlined_call_operand.vmem [shape: f32[2], index: 1, kind: input, shape index: {}]   ;;  %s1072_s2 = inlined_call_operand.hbm [shape: f32[2,3,2,128], index: 2, kind: input, shape index: {}]   ;;  %s1073_s3 = inlined_call_operand.hbm [shape: f32[2,3,2,128], index: 3, kind: output, shape index: {}]  }
   0x1   :  { %9 = vsyncpa [#allocation6], 0 }
   0x2   :  { %10 = vsyncpa [#allocation3], 0 }
   0x3   :  { %12 = vsyncpa [#allocation3 + $0x1], 0 }
   0x4   :  { %13 = vsyncpa [#allocation4], 0 }
   0x5   :  { %15 = vsyncpa [#allocation4 + $0x1], 0  ;;  %s811_s12 = smov 0   ;;  %s813_s13 = smov 0  }
   0x6   :  { %s815_s14 = smov 0   ;;  %s817_s15 = smov 0  }
   0x7   :  { %s819_s16 = smov 0   ;;  %s821_s17 = smov 0  }
   0x8 LB: > { %s518_s18 = sadd.s32 4294967295, %s781_s17   ;;  %s519_s19 = sadd.s32 4294967294, %s781_s17   ;;  %s781_s17 = sphi %s821_s17, %s21_s17   ;;  %s777_s16 = sphi %s819_s16, %s1094_s16   ;;  %s773_s15 = sphi %s817_s15, %s1093_s15   ;;  %s769_s14 = sphi %s815_s14, %s1092_s14   ;;  %s765_s13 = sphi %s813_s13, %s1091_s13   ;;  %s761_s12 = sphi %s811_s12, %s1090_s12  }
   0x9   : > { %s84_s20 = sadd.s32 1, %s769_s14  ;;  %p91_p0 = scmp.ne.s32.totalorder %s769_s14, %s765_s13 }
   0xa   : > { %p92_p1 = scmp.eq.s32.totalorder %s781_s17, 0  ;;  %p97_p2 = scmp.ne.s32.totalorder %s765_s13, %s761_s12 }
   0xb   : > { %p849_p3 = scmp.eq.s32.totalorder %s518_s18, 0  ;;  %p123_p4 = scmp.eq.s32.totalorder %s518_s18, 1 }
   0xc   : > { %p93_p5 = por %p92_p1, %p91_p0  ;;  %p129_p6 = scmp.eq.s32.totalorder %s519_s19, 1 }
   0xd   : > { %s1078_s21 = scalar_select %p849_p3, 1, 0 }
   0xe   : > { %p855_p7 = por %p849_p3, %p97_p2  ;;  %p859_p8 = por %p123_p4, %p91_p0 }
   0xf   : > { %p863_p9 = por %p129_p6, %p97_p2  ;;  %p520_p10 = scmp.ge.s32.totalorder %s781_s17, 1 }
  0x10   : > { %s1079_s22 = scalar_select %p855_p7, 1, 0 }
  0x11   : > { %s1080_s23 = scalar_select %p859_p8, 1, 0 }
  0x12   : > { %s1081_s24 = scalar_select %p863_p9, 1, 0 }
  0x13   : > { %p136_p11 = scmp.lt.s32.totalorder %s781_s17, 3  ;;  %p571_p1 = scmp.lt.s32.totalorder %s781_s17, 2 }
  0x14   : > { %s158_s28 = sshll.u32 %s1071_s1, 4  ;;  %s169_s4 = sand.u32 1, %s769_s14   ;;  %s159_s28 = int_to_ptr.vmem [resolvable:$true] %s158_s28 }
  0x15   : > { %p870_p13 = pnand %p520_p10, %p136_p11  ;;  %p880_p4 = pnand %p571_p1, %p93_p5 }
  0x16   : > { %s33_s5 = sadd.s32 1, %s777_s16  ;;  %s633_s8 = scalar_lea.hbm %s1070_s0, 16 }
  0x17   : > { %p554_p0 = pneg %p870_p13  ;;  %p634_p5 = scmp.ne.s32.totalorder %s1070_s0, %s633_s8 }
  0x18   : > { %p640_p1 = scmp.lt.u32.totalorder %s633_s8, %s1070_s0 }
  0x19   : > { %p886_p2 = pnand %p554_p0, %p849_p3 }
  0x1b   : > { %p635_p6 = pneg %p886_p2 }
  0x1d   : > { %p636_p10 = pnand %p635_p6, %p634_p5 }
  0x1f   : > { %p637_p11 = pneg %p636_p10 }
  0x21   : > { %p642_p0 = pnand %p640_p1, %p637_p11 }
  0x23   : > { %645 = shalt.err (!%p642_p0)
}
  0x24   : > { %s783_s19 = smov [#allocation2]   ;;  %s646_s6 = scalar_lea.vmem %s159_s28, 16 }
  0x25   : > { %557 = dma.hbm_to_smem (!%p886_p2), %s1070_s0, 16, %s783_s19, [#allocation5]  }
  0x26   : > { %p647_p12 = scmp.ne.s32.totalorder %s159_s28, %s646_s6  ;;  %p654_p7 = scmp.lt.s32.totalorder %s159_s28, %s159_s28 }
  0x27   : > { %p655_p5 = scmp.lt.s32.totalorder %s646_s6, %s646_s6 }
  0x28   : > { %p649_p9 = pnand %p647_p12, %p635_p6 }
  0x29   : > { %p656_p10 = por %p655_p5, %p654_p7 }
  0x2a   : > { %p650_p8 = pneg %p649_p9 }
  0x2c   : > { %p657_p3 = pnand %p656_p10, %p650_p8 }
  0x2e   : > { %660 = shalt.err (!%p657_p3)
}
  0x2f   : > { %s784_s7 = smov [#allocation7]   ;;  %p35_p11 = scmp.ge.s32.totalorder %s33_s5, 2 }
  0x30   : > { %560 = dma.vmem_to_smem (!%p886_p2), %s159_s28, 16, %s784_s7, [#allocation6]  }
  0x31   : > { %s538_s8 = smul.u32 6, %s169_s4  ;;  %s1096_s5 = smov (%p35_p11, %s33_s5), 0 }
  0x32   : > { %s539_s9 = smul.u32 96, %s777_s16  ;;  %s79_s10 = ssub.s32 %s777_s16, %s1096_s5 }
  0x33   : > { %s173_s11 = scalar_lea.vmem [#allocation8], %s538_s8  ;;  %p82_p3 = scmp.eq.s32.totalorder %s79_s10, 0 }
  0x34   : > { %s181_s18 = sshll.u32 %s173_s11, 4  ;;  %s920_s26 = scalar_lea.hbm %s1072_s2, %s539_s9  ;;  %s922_s18 = int_to_ptr.vmem [resolvable:$true] %s181_s18 }
  0x35   : > { %s927_s28 = scalar_select %p82_p3, %s769_s14, %s84_s20  }
  0x36   : > { %s931_s27 = scalar_lea.sflag [#allocation3], %s169_s4  ;;  %s661_s6 = scalar_lea.hbm %s920_s26, 96 }
  0x37   : > { %p662_p7 = scmp.ne.s32.totalorder %s920_s26, %s661_s6  ;;  %p663_p8 = pneg %p880_p4 }
  0x38   : > { %s666_s9 = scalar_lea.hbm %s1072_s2, 192  ;;  %p667_p2 = scmp.lt.u32.totalorder %s920_s26, %s1072_s2 }
  0x39   : > { %p664_p9 = pnand %p663_p8, %p662_p7  ;;  %p668_p6 = scmp.lt.u32.totalorder %s666_s9, %s661_s6 }
  0x3a   : > { %p670_p0 = scmp.lt.u32.totalorder %s661_s6, %s920_s26 }
  0x3b   : > { %p665_p12 = pneg %p664_p9  ;;  %p669_p1 = por %p668_p6, %p667_p2 }
  0x3d   : > { %p671_p5 = por %p670_p0, %p669_p1 }
  0x3f   : > { %p672_p10 = pnand %p671_p5, %p665_p12 }
  0x41   : > { %675 = shalt.err (!%p672_p10)
}
  0x42   : > { %s676_s20 = scalar_lea.vmem %s922_s18, 96  ;;  %s785_s4 = smov [#allocation8]  }
  0x43   : > { %p677_p11 = scmp.ne.s32.totalorder %s922_s18, %s676_s20  ;;  %s681_s30 = sshll.u32 %s785_s4, 4  ;;  %s682_s30 = int_to_ptr.vmem [resolvable:$false] %s681_s30 }
  0x44   : > { %s683_s19 = scalar_lea.vmem %s682_s30, 192  ;;  %p684_p9 = scmp.lt.s32.totalorder %s922_s18, %s682_s30 }
  0x45   : > { %p679_p3 = pnand %p677_p11, %p663_p8  ;;  %p685_p2 = scmp.lt.s32.totalorder %s683_s19, %s676_s20 }
  0x47   : > { %p680_p7 = pneg %p679_p3  ;;  %p686_p6 = por %p685_p2, %p684_p9 }
  0x49   : > { %p687_p1 = pnand %p686_p6, %p680_p7 }
  0x4b   : > { %690 = shalt.err (!%p687_p1)
}
  0x4c   : > { %s786_s6 = smov 32   ;;  %s787_s7 = smov 2  }
  0x4d   : > { %564 = dma.hbm_to_vmem [thread:$0]  (!%p880_p4), %s920_s26, 96, %s922_s18, %s931_s27, %s786_s6, %s786_s6, %s787_s7  }
  0x4e   : > { %193 = sbr.rel (%p870_p13) target bundleno = 234 (0xea), region = 32  ;;  %p1085_p8 = scmp.ne.s32.totalorder (!%p870_p13), %s1078_s21, 0 }
  0x55   : > { %744 = dma.done.wait (%p1085_p8), [#allocation5], 16  }
  0x56   : > { %746 = vsyncadd (%p1085_p8), [#allocation5], 4294967280 }
  0x57   : > { %748 = dma.done.wait (%p1085_p8), [#allocation6], 16  }
  0x58   : > { %750 = vsyncadd (%p1085_p8), [#allocation6], 4294967280  ;;  %s970_s8 = sand.u32 1, %s765_s13   ;;  %p1086_p13 = scmp.ne.s32.totalorder %s1079_s22, 0 }
  0x59   : > { %s540_s25 = smul.u32 6, %s970_s8  ;;  %s204_s29 = scalar_lea.sflag [#allocation3], %s970_s8 }
  0x5b   : > { %s207_s18 = scalar_lea.vmem [#allocation8], %s540_s25 }
  0x5c   : > { %752 = dma.done.wait (%p1086_p13), %s204_s29, 96  }
  0x5d   : > { %754 = vsyncadd (%p1086_p13), %s204_s29, 4294967200 }
  0x5e   : > { %212 = sfence }
  0x5f   : > { %s528_s26 = sld [smem:[#allocation2 + $0x1]]  ;;  %v236_v0 = vld [vmem:[%s207_s18] sm:$0x3]  ;;  %v531_v1 = vld [vmem:[%s207_s18 + $0x2] sm:$0x3]  ;;  %s529_s9 = sld [smem:[#allocation2 + $0x2]] }
  0x60   : > { %s235_s21 = sld [smem:[#allocation7 + %s773_s15]]  ;;  %v532_v2 = vld [vmem:[%s207_s18 + $0x4] sm:$0x3]  ;;  %s230_s4 = scalar_lea.vmem [#allocation9], %s540_s25 }
  0x61   : > { %s530_s11 = sld [smem:[#allocation2 + $0x3]]  ;;  %s231_s20 = sld [smem:[#allocation2]] }
  0x62   : > { %s409_s30 = sshll.u32 %s230_s4, 4  ;;  %s541_s19 = smul.u32 96, %s773_s15  ;;  %s1016_s30 = int_to_ptr.vmem [resolvable:$true] %s409_s30 }
  0x63   : > { %s395_s25 = scalar_lea.sflag [#allocation4], %s970_s8  ;;  %s691_s18 = scalar_lea.vmem %s1016_s30, 96 }
  0x64   : > { %s1021_s29 = scalar_lea.hbm %s1073_s3, %s541_s19  ;;  %p692_p4 = scmp.ne.s32.totalorder %s1016_s30, %s691_s18 }
  0x65   : > { %v241_v3 = vstv %s528_s26  ;;  %s243_s27 = ssub.f32 1.0, %s528_s26  ;;  %v262_v20 = vstv %s529_s9  ;;  %p1087_p12 = scmp.ne.s32.totalorder %s1080_s23, 0 }
  0x66   : > { %v242_v4 = vmul.f32 %v241_v3, %v236_v0  ;;  %v249_v5 = vmul.f32 %v531_v1, %v241_v3  ;;  %v253_v6 = vmul.f32 %v532_v2, %v241_v3  ;;  %s264_s22 = ssub.f32 1.0, %s529_s9  ;;  %s788_s15 = smov [#allocation9]  }
  0x67   : > { %s244_s10 = smul.f32 %s243_s27, %s235_s21  ;;  %p693_p0 = pnand %p692_p4, %p1087_p12 }
  0x68   : > { %v265_v22 = vstv %s264_s22  ;;  %s695_s26 = sshll.u32 %s788_s15, 4  ;;  %s696_s26 = int_to_ptr.vmem [resolvable:$false] %s695_s26 }
  0x69   : > { %v245_v7 = vstv %s244_s10  ;;  %p694_p5 = pneg %p693_p0  ;;  %s697_s21 = scalar_lea.vmem %s696_s26, 192 }
  0x6a   : > { %v246_v8 = vadd.f32 %v245_v7, %v242_v4  ;;  %v250_v9 = vadd.f32 %v249_v5, %v245_v7  ;;  %v254_v10 = vadd.f32 %v253_v6, %v245_v7  ;;  %v323_v4 = vstv %s530_s11  ;;  %p698_p10 = scmp.lt.s32.totalorder %s1016_s30, %s696_s26  ;;  %p699_p11 = scmp.lt.s32.totalorder %s697_s21, %s691_s18 }
  0x6c   : > { %v247_v11 = vmax.f32 %v246_v8, 0.0  ;;  %v251_v12 = vmax.f32 %v250_v9, 0.0  ;;  %v255_v13 = vmax.f32 %v254_v10, 0.0  ;;  %p700_p3 = por %p699_p11, %p698_p10 }
  0x6e   : > { %v248_v14 = vmin.f32 %v247_v11, 1.0  ;;  %v252_v15 = vmin.f32 %v251_v12, 1.0  ;;  %v256_v16 = vmin.f32 %v255_v13, 1.0  ;;  %p701_p7 = pnand %p700_p3, %p694_p5 }
  0x70   : > { %v257_v17 = vmul.f32 0.2989, %v248_v14  ;;  %v258_v18 = vmul.f32 0.587, %v252_v15  ;;  %v260_v19 = vmul.f32 0.114, %v256_v16  ;;  %v263_v24 = vmul.f32 %v262_v20, %v248_v14 }
  0x71   : > { %v270_v25 = vmul.f32 %v262_v20, %v252_v15  ;;  %v274_v26 = vmul.f32 %v262_v20, %v256_v16 }
  0x72   : > { %v259_v21 = vadd.f32 %v258_v18, %v257_v17 }
  0x74   : > { %v261_v23 = vadd.f32 %v260_v19, %v259_v21 }
  0x76   : > { %v266_v27 = vmul.f32 %v265_v22, %v261_v23 }
  0x78   : > { %v267_v28 = vadd.f32 %v266_v27, %v263_v24  ;;  %v271_v29 = vadd.f32 %v270_v25, %v266_v27  ;;  %v275_v30 = vadd.f32 %v274_v26, %v266_v27 }
  0x7a   : > { %v268_v31 = vmax.f32 %v267_v28, 0.0  ;;  %v272_v32 = vmax.f32 %v271_v29, 0.0  ;;  %v276_v33 = vmax.f32 %v275_v30, 0.0 }
  0x7c   : > { %v269_v34 = vmin.f32 %v268_v31, 1.0  ;;  %v273_v35 = vmin.f32 %v272_v32, 1.0  ;;  %v277_v36 = vmin.f32 %v276_v33, 1.0 }
  0x7e   : > { %v278_v37 = vmax.f32 %v269_v34, %v273_v35  ;;  %v280_v38 = vmin.f32 %v269_v34, %v273_v35 }
  0x80   : > { %v981_v39 = vmax.f32 %v278_v37, %v277_v36  ;;  %v281_v40 = vmin.f32 %v280_v38, %v277_v36 }
  0x82   : > { %vm282_vm0 = vcmp.eq.f32.partialorder %v981_v39, %v281_v40  ;;  %v283_v41 = vsub.f32 %v981_v39, %v281_v40  ;;  %v290_v43 = vsub.f32 %v981_v39, %v269_v34  ;;  %v292_v44 = vsub.f32 %v981_v39, %v273_v35 }
  0x83   : > { %v294_v45 = vsub.f32 %v981_v39, %v277_v36  ;;  %vm297_vm1 = vcmp.eq.f32.partialorder %v981_v39, %v273_v35  ;;  %vm296_vm2 = vcmp.eq.f32.partialorder %v981_v39, %v269_v34  ;;  %v284_v6 = vsel %vm282_vm0, 1.0, %v981_v39 }
  0x84   : > { %v287_v42 = vsel %vm282_vm0, 1.0, %v283_v41 }
  0x85   : > { %629 = vrcp.f32 %v287_v42 }
  0x86   : > { %631 = vrcp.f32 %v284_v6 }
  0x8f   : > { %v630_v46 = vpop.eup %629 }
  0x90   : > { %v291_v47 = vmul.f32 %v630_v46, %v290_v43  ;;  %v293_v48 = vmul.f32 %v630_v46, %v292_v44  ;;  %v295_v49 = vmul.f32 %v630_v46, %v294_v45  ;;  %v632_v14 = vpop.eup %631 }
  0x91   : > { %v286_v17 = vmul.f32 %v632_v14, %v283_v41  ;;  %v379_v41 = vstv %s231_s20 }
  0x92   : > { %v299_v50 = vadd.f32 2.0, %v291_v47  ;;  %v301_v51 = vadd.f32 4.0, %v293_v48  ;;  %v298_v52 = vsub.f32 %v295_v49, %v293_v48 }
  0x93   : > { %v345_v20 = vsub.f32 1.0, %v286_v17 }
  0x94   : > { %v300_v53 = vsub.f32 %v299_v50, %v295_v49  ;;  %v302_v54 = vsub.f32 %v301_v51, %v291_v47 }
  0x95   : > { %v346_v23 = vmul.f32 %v345_v20, %v981_v39 }
  0x96   : > { %v303_v55 = vsel %vm297_vm1, %v300_v53, %v302_v54 }
  0x97   : > { %v304_v56 = vsel %vm296_vm2, %v298_v52, %v303_v55  ;;  %v347_v26 = vmax.f32 %v346_v23, 0.0 }
  0x98   : > { %v305_v57 = vand.u32 2147483647, %v304_v56  ;;  %v314_v62 = vand.u32 2147483648, %v304_v56 }
  0x99   : > { %v348_v32 = vmin.f32 %v347_v26, 1.0 }
  0x9a   : > { %v307_v58 = vmul.f32 0.16666667, %v305_v57 }
  0x9c   : > { %v308_v59 = vfloor.f32 %v307_v58 }
  0x9e   : > { %v309_v60 = vmul.f32 6.0, %v308_v59 }
  0xa0   : > { %v310_v61 = vsub.f32 %v305_v57, %v309_v60 }
  0xa2   : > { %vm311_vm3 = vcmp.eq.f32.partialorder %v310_v61, 6.0 }
  0xa3   : > { %v312_v63 = vsel %vm311_vm3, 0.0, %v310_v61 }
  0xa4   : > { %v313_v0 = vand.u32 2147483647, %v312_v63 }
  0xa6   : > { %v315_v1 = vor.u32 %v314_v62, %v313_v0 }
  0xa8   : > { %vm316_vm4 = vcmp.ne.f32.partialorder %v315_v1, 0.0  ;;  %vm317_vm5 = vcmp.lt.f32.partialorder %v315_v1, 0.0  ;;  %v319_v2 = vadd.f32 6.0, %v315_v1 }
  0xa9   : > { %vm318_vm6 = vmand %vm317_vm5, %vm316_vm4 }
  0xaa   : > { %v320_v3 = vsel %vm318_vm6, %v319_v2, %v315_v1 }
  0xab   : > { %v322_v5 = vmul.f32 0.16666667, %v320_v3 }
  0xad   : > { %v324_v7 = vadd.f32 %v323_v4, %v322_v5 }
  0xaf   : > { %v325_v8 = vand.u32 2147483647, %v324_v7  ;;  %v333_v11 = vand.u32 2147483648, %v324_v7 }
  0xb1   : > { %v328_v9 = vfloor.f32 %v325_v8 }
  0xb3   : > { %v329_v10 = vsub.f32 %v325_v8, %v328_v9 }
  0xb5   : > { %vm330_vm7 = vcmp.eq.f32.partialorder %v329_v10, 1.0 }
  0xb6   : > { %v331_v12 = vsel %vm330_vm7, 0.0, %v329_v10 }
  0xb7   : > { %v332_v13 = vand.u32 2147483647, %v331_v12 }
  0xb9   : > { %v334_v15 = vor.u32 %v333_v11, %v332_v13 }
  0xbb   : > { %vm335_vm8 = vcmp.ne.f32.partialorder %v334_v15, 0.0  ;;  %vm336_vm9 = vcmp.lt.f32.partialorder %v334_v15, 0.0  ;;  %v338_v16 = vadd.f32 1.0, %v334_v15 }
  0xbc   : > { %vm337_vm10 = vmand %vm336_vm9, %vm335_vm8 }
  0xbd   : > { %v339_v18 = vsel %vm337_vm10, %v338_v16, %v334_v15 }
  0xbe   : > { %v340_v19 = vmul.f32 6.0, %v339_v18 }
  0xc0   : > { %v341_v21 = vfloor.f32 %v340_v19 }
  0xc2   : > { %v342_v22 = vsub.f32 %v340_v19, %v341_v21  ;;  %vm343_vm11 = vcmp.ge.f32.partialorder %v341_v21, 6.0 }
  0xc3   : > { %v344_v29 = vsel %vm343_vm11, 0.0, %v341_v21 }
  0xc4   : > { %v349_v24 = vmul.f32 %v342_v22, %v286_v17  ;;  %v354_v25 = vsub.f32 1.0, %v342_v22  ;;  %vm363_vm12 = vcmp.lt.f32.partialorder %v344_v29, 3.5  ;;  %vm364_vm13 = vcmp.lt.f32.partialorder %v344_v29, 4.5 }
  0xc5   : > { %vm362_vm14 = vcmp.lt.f32.partialorder %v344_v29, 2.5  ;;  %vm361_vm15 = vcmp.lt.f32.partialorder %v344_v29, 1.5  ;;  %vm360_vm0 = vcmp.lt.f32.partialorder %v344_v29, 0.5 }
  0xc6   : > { %v350_v27 = vsub.f32 1.0, %v349_v24  ;;  %v355_v28 = vmul.f32 %v354_v25, %v286_v17 }
  0xc8   : > { %v351_v30 = vmul.f32 %v350_v27, %v981_v39  ;;  %v356_v31 = vsub.f32 1.0, %v355_v28 }
  0xca   : > { %v352_v33 = vmax.f32 %v351_v30, 0.0  ;;  %v357_v34 = vmul.f32 %v356_v31, %v981_v39 }
  0xcc   : > { %v353_v35 = vmin.f32 %v352_v33, 1.0  ;;  %v358_v36 = vmax.f32 %v357_v34, 0.0 }
  0xce   : > { %v359_v37 = vmin.f32 %v358_v36, 1.0  ;;  %v370_v38 = vsel %vm363_vm12, %v353_v35, %v348_v32  ;;  %v374_v40 = vsel %vm364_vm13, %v981_v39, %v353_v35 }
  0xcf   : > { %v371_v42 = vsel %vm362_vm14, %v981_v39, %v370_v38  ;;  %v375_v43 = vsel %vm363_vm12, %v981_v39, %v374_v40 }
  0xd0   : > { %v365_v44 = vsel %vm364_vm13, %v359_v37, %v981_v39  ;;  %v372_v45 = vsel %vm361_vm15, %v981_v39, %v371_v42  ;;  %v376_v46 = vsel %vm362_vm14, %v359_v37, %v375_v43 }
  0xd1   : > { %v366_v47 = vsel %vm363_vm12, %v348_v32, %v365_v44  ;;  %v373_v48 = vsel %vm360_vm0, %v359_v37, %v372_v45  ;;  %v377_v49 = vsel %vm361_vm15, %v348_v32, %v376_v46 }
  0xd2   : > { %v367_v50 = vsel %vm362_vm14, %v348_v32, %v366_v47  ;;  %v383_v51 = vmul.f32 %v379_v41, %v373_v48  ;;  %v378_v52 = vsel %vm360_vm0, %v348_v32, %v377_v49 }
  0xd3   : > { %v368_v53 = vsel %vm361_vm15, %v353_v35, %v367_v50  ;;  %v386_v54 = vmul.f32 %v379_v41, %v378_v52 }
  0xd4   : > { %v369_v55 = vsel %vm360_vm0, %v981_v39, %v368_v53  ;;  %v384_v56 = vmax.f32 %v383_v51, 0.0 }
  0xd5   : > { %v380_v57 = vmul.f32 %v379_v41, %v369_v55  ;;  %v387_v58 = vmax.f32 %v386_v54, 0.0 }
  0xd6   : > { %v385_v59 = vmin.f32 %v384_v56, 1.0 }
  0xd7   : > { %v381_v60 = vmax.f32 %v380_v57, 0.0  ;;  %v388_v61 = vmin.f32 %v387_v58, 1.0 }
  0xd8   : > { %533 = vst [vmem:[%s230_s4 + $0x2] sm:$0x3] %v385_v59 }
  0xd9   : > { %v382_v62 = vmin.f32 %v381_v60, 1.0  ;;  %534 = vst [vmem:[%s230_s4 + $0x4] sm:$0x3] %v388_v61 }
  0xdb   : > { %389 = vst [vmem:[%s230_s4] sm:$0x3] %v382_v62 }
  0xdc   : > { %704 = shalt.err (!%p701_p7)
}
  0xdd   : > { %s705_s27 = scalar_lea.hbm %s1021_s29, 96  ;;  %s709_s22 = scalar_lea.hbm %s1073_s3, 192 }
  0xde   : > { %p706_p9 = scmp.ne.s32.totalorder %s1021_s29, %s705_s27  ;;  %p710_p1 = scmp.lt.u32.totalorder %s1021_s29, %s1073_s3 }
  0xdf   : > { %p711_p8 = scmp.lt.u32.totalorder %s709_s22, %s705_s27  ;;  %p713_p4 = scmp.lt.u32.totalorder %s705_s27, %s1021_s29 }
  0xe0   : > { %p707_p2 = pnand %p706_p9, %p1087_p12 }
  0xe1   : > { %p712_p13 = por %p711_p8, %p710_p1 }
  0xe2   : > { %p708_p6 = pneg %p707_p2 }
  0xe3   : > { %p714_p0 = por %p713_p4, %p712_p13 }
  0xe5   : > { %p715_p5 = pnand %p714_p0, %p708_p6 }
  0xe7   : > { %718 = shalt.err (!%p715_p5)
}
  0xe8   : > { %s789_s4 = smov 32   ;;  %s790_s19 = smov 2  }
  0xe9   : > { %552 = dma.vmem_to_hbm [thread:$0]  (%p1087_p12), %s1016_s30, 96, %s1021_s29, %s395_s25, %s789_s4, %s789_s4, %s790_s19  }
  0xea PF: > { %s424_s6 = sand.u32 1, %s761_s12   ;;  %p1088_p10 = scmp.ne.s32.totalorder %s1081_s24, 0 }
  0xeb   : > { %p1089_p11 = scmp.ge.s32.totalorder %s781_s17, 2  ;;  %s425_s7 = scalar_lea.sflag [#allocation4], %s424_s6 }
  0xed   : > { %p566_p3 = pnand %p1089_p11, %p1088_p10 }
  0xef   : > { %756 = dma.done.wait (!%p566_p3), %s425_s7, 96  }
  0xf0   : > { %758 = vsyncadd (!%p566_p3), %s425_s7, 4294967200  ;;  %s21_s17 = sadd.s32 1, %s781_s17   ;;  %s1090_s12 = smov %s765_s13 }
  0xf1   : > { %p18_p7 = scmp.ge.s32.totalorder %s21_s17, 4   ;;  %s1091_s13 = smov %s769_s14 }
  0xf2   : > { %s1092_s14 = smov %s927_s28  ;;  %s1093_s15 = smov %s777_s16 }
  0xf3   : > { %s1094_s16 = smov %s1096_s5  ;;  %20 = sbr.rel (!%p18_p7) target bundleno = 8 (0x8), region = 91 }
  0xfa   :  { %430 = vsyncpa [#allocation3], 1 }
  0xfb   :  { %432 = vsyncpa [#allocation3 + $0x1], 1 }
  0xfc   :  { %433 = vsyncpa [#allocation4], 1 }
  0xfd   :  { %435 = vsyncpa [#allocation4 + $0x1], 1 }
  0xfe   :  { %436 = vsyncpa [#allocation5], 1 }
  0xff   :  { %438 = vsyncpa [#allocation5 + $0x1], 1 }
 0x100   :  { %439 = vsyncpa [#allocation6], 1 }
 0x101   :  { %441 = vsyncpa [#allocation6 + $0x1], 1 }

</bundles_post_ra>
